<compile_context>
chip_gen: v7x
topology: tpu7x:2x2x1
jax: 0.10.0
libtpu: 0.0.40
codegen_flags: <defaults>
</compile_context>

<pallas_src>
import math

import jax
import jax.numpy as jnp
from jax.experimental import pallas as pl
from jax.experimental.pallas import tpu as pltpu


# ----------------------------- VMEM budgeting helpers -----------------------------

def _round_up(x, m):
    return ((x + m - 1) // m) * m


def _padded_tile_bytes(rows, cols, itemsize):
    # VMEM tiles pad the second-to-last dim to 8 sublanes, last dim to 128 lanes.
    return _round_up(max(rows, 1), 8) * _round_up(max(cols, 1), 128) * itemsize


def _step_vmem_bytes(tb, Q, K, D, V, in_itemsize, masked):
    """Approximate VMEM working set of one grid step (2-deep pipelined I/O + f32 temps)."""
    per_batch = 0
    per_batch += 2 * _padded_tile_bytes(Q, D, in_itemsize)   # queries tile (double-buffered)
    per_batch += 2 * _padded_tile_bytes(K, D, in_itemsize)   # keys tile
    per_batch += 2 * _padded_tile_bytes(K, V, in_itemsize)   # values tile
    per_batch += 2 * _padded_tile_bytes(Q, V, in_itemsize)   # output tile
    if masked:
        per_batch += 2 * _padded_tile_bytes(Q, K, 4)         # f32 mask bias tile
    # f32 scores / exp / weights (+ cast copy) and the f32 accumulator before the store cast.
    per_batch += 4 * _padded_tile_bytes(Q, K, 4)
    per_batch += 1 * _padded_tile_bytes(Q, V, 4)
    return tb * per_batch


def _physical_vmem_bytes():
    try:
        return int(getattr(pltpu.get_tpu_info(), "vmem_capacity_bytes", 64 << 20))
    except Exception:
        return 64 << 20  # v7x per-TC size = the most conservative of v5e/v6e/v7x


def _pick_block_b(B, Q, K, D, V, in_itemsize, masked, vmem_budget):
    """Largest divisor of B whose per-step working set fits vmem_budget.

    Capped at B//2 so the grid always has >= 2 steps, letting dimension_semantics
    ("parallel",) shard the batch axis across the two v7x TensorCores (no cost on
    single-TC v5e/v6e).
    """
    cap = max(1, B // 2)
    best = 1
    for tb in range(1, cap + 1):
        if B % tb == 0 and _step_vmem_bytes(tb, Q, K, D, V, in_itemsize, masked) <= vmem_budget:
            best = tb
    return best


# ----------------------------------- kernels ---------------------------------------

def _attn_core(q, k, v, out_dtype, bias=None):
    """q (tb,Q,D), k (tb,K,D), v (tb,K,V) in their native (possibly bf16) dtype.

    bias: optional f32 (tb,Q,K) of {0, -1e6}; masked positions get REPLACED by -1e6
    (exact sequence_mask semantics, including fully-masked rows -> uniform softmax).
    """
    d = q.shape[-1]
    # Native-dtype operands straight to the MXU; f32 accumulation. No in-kernel k.T.
    scores = jnp.einsum("bqd,bkd->bqk", q, k, preferred_element_type=jnp.float32)
    # Scale the f32 scores (exact regardless of operand dtype; bias-free precision).
    scores = scores * jnp.float32(1.0 / math.sqrt(d))

    if bias is not None:
        # Replacement masking: value -1e6 where bias is nonzero (one vcmp + vsel).
        scores = jnp.where(bias == 0.0, scores, bias)

    # Row-wise softmax in f32; denominator reciprocal on the EUP (free slot next to exp).
    m = jnp.max(scores, axis=-1, keepdims=True)
    e = jnp.exp(scores - m)
    denom = jnp.sum(e, axis=-1, keepdims=True)
    w = e * pl.reciprocal(denom, approx=True)

    # Second bmm: weights cast to v's native dtype, f32 accumulation.
    out = jnp.einsum("bqk,bkv->bqv", w.astype(v.dtype), v,
                     preferred_element_type=jnp.float32)
    return out.astype(out_dtype)


def _attention_kernel_masked(bias_ref, q_ref, k_ref, v_ref, o_ref):
    o_ref[...] = _attn_core(q_ref[...], k_ref[...], v_ref[...], o_ref.dtype,
                            bias=bias_ref[...])


def _attention_kernel_nomask(q_ref, k_ref, v_ref, o_ref):
    o_ref[...] = _attn_core(q_ref[...], k_ref[...], v_ref[...], o_ref.dtype)


# ----------------------------------- wrapper ---------------------------------------

def dot_product_attention(queries, keys, values, valid_lens=None, *,
                          block_b=None, mxu_dtype=None):
    """queries (B,Q,D), keys (B,K,D), values (B,K,V); valid_lens None, (B,) or (B,Q).

    mxu_dtype: optional reduced-precision operand dtype (e.g. jnp.bfloat16). Casting
    happens here in the wrapper so input HBM traffic halves as well; softmax math and
    both matmul accumulations remain f32. Output keeps the original input dtype.
    """
    B, Q, D = queries.shape
    _, K, _ = keys.shape
    V = values.shape[-1]
    out_dtype = queries.dtype

    if mxu_dtype is not None:
        queries = queries.astype(mxu_dtype)
        keys = keys.astype(mxu_dtype)
        values = values.astype(mxu_dtype)

    in_itemsize = jnp.dtype(queries.dtype).itemsize
    masked = valid_lens is not None

    phys_vmem = _physical_vmem_bytes()
    vmem_budget = phys_vmem // 2
    if block_b is None:
        tb = _pick_block_b(B, Q, K, D, V, in_itemsize, masked, vmem_budget)
    else:
        tb = block_b
    assert B % tb == 0
    grid = (B // tb,)

    step_bytes = _step_vmem_bytes(tb, Q, K, D, V, in_itemsize, masked)
    vmem_limit = int(min(phys_vmem - (4 << 20), max(32 << 20, step_bytes + (8 << 20))))

    in_specs = [
        pl.BlockSpec((tb, Q, D), lambda b: (b, 0, 0)),  # queries
        pl.BlockSpec((tb, K, D), lambda b: (b, 0, 0)),  # keys
        pl.BlockSpec((tb, K, V), lambda b: (b, 0, 0)),  # values
    ]
    args = [queries, keys, values]

    if masked:
        # Normalize valid_lens to (B, Q) int32 and precompute the f32 {0,-1e6} bias in
        # the wrapper: no per-step (tb,Q,1) DMA, no in-kernel iota / lane-sparse broadcast.
        vl = jnp.asarray(valid_lens, dtype=jnp.int32)
        if vl.ndim == 1:
            vl = jnp.broadcast_to(vl[:, None], (B, Q))
        else:
            vl = vl.reshape(B, Q)
        keep = jnp.arange(K, dtype=jnp.int32)[None, None, :] < vl[:, :, None]   # (B,Q,K)
        bias = jnp.where(keep, jnp.float32(0.0), jnp.float32(-1e6))             # (B,Q,K) f32
        in_specs = [pl.BlockSpec((tb, Q, K), lambda b: (b, 0, 0))] + in_specs
        args = [bias] + args
        kernel = _attention_kernel_masked
    else:
        kernel = _attention_kernel_nomask

    return pl.pallas_call(
        kernel,
        out_shape=jax.ShapeDtypeStruct((B, Q, V), out_dtype),
        grid=grid,
        in_specs=in_specs,
        out_specs=pl.BlockSpec((tb, Q, V), lambda b: (b, 0, 0)),
        compiler_params=pltpu.CompilerParams(
            dimension_semantics=("parallel",),
            vmem_limit_bytes=vmem_limit,
        ),
    )(*args)


# ---------------------------------- reference ---------------------------------------

def _reference(queries, keys, values, valid_lens):
    """Pure-JAX reference mirroring the PyTorch masked_softmax semantics."""
    B, Q, D = queries.shape
    K = keys.shape[1]
    scores = jnp.einsum("bqd,bkd->bqk", queries, keys) / math.sqrt(D)
    if valid_lens is not None:
        vl = jnp.asarray(valid_lens, dtype=jnp.int32)
        if vl.ndim == 1:
            vl = jnp.broadcast_to(vl[:, None], (B, Q))
        else:
            vl = vl.reshape(B, Q)
        mask = jnp.arange(K)[None, None, :] < vl[:, :, None]
        scores = jnp.where(mask, scores, -1e6)
    w = jax.nn.softmax(scores, axis=-1)
    return jnp.einsum("bqk,bkv->bqv", w, values)


if __name__ == "__main__":
    B, Q, K, D, V = 2, 8, 8, 32, 32
    key = jax.random.PRNGKey(0)
    kq, kk, kv, kl = jax.random.split(key, 4)
    queries = jax.random.normal(kq, (B, Q, D), dtype=jnp.float32)
    keys = jax.random.normal(kk, (B, K, D), dtype=jnp.float32)
    values = jax.random.normal(kv, (B, K, V), dtype=jnp.float32)

    # f32 path: only source of error is pl.reciprocal(approx=True) in the softmax denom.
    TOL_F32 = dict(atol=2e-3, rtol=2e-3)
    # bf16-operand path: loose smoke check against the f32 reference.
    TOL_BF16 = dict(atol=1e-1, rtol=1e-1)

    # 1) per-batch valid_lens, shape (B,)
    valid_lens = jnp.array([3, 6], dtype=jnp.int32)
    out = jax.block_until_ready(dot_product_attention(queries, keys, values, valid_lens))
    ref = _reference(queries, keys, values, valid_lens)
    assert out.shape == (B, Q, V)
    assert jnp.allclose(out, ref, **TOL_F32), "mismatch vs reference (1-D valid_lens)"

    # 2) per-query valid_lens, shape (B, Q)
    valid_lens_2d = jax.random.randint(kl, (B, Q), 1, K + 1).astype(jnp.int32)
    out2 = jax.block_until_ready(dot_product_attention(queries, keys, values, valid_lens_2d))
    ref2 = _reference(queries, keys, values, valid_lens_2d)
    assert jnp.allclose(out2, ref2, **TOL_F32), "mismatch vs reference (2-D valid_lens)"

    # 3) no mask
    out3 = jax.block_until_ready(dot_product_attention(queries, keys, values, None))
    ref3 = _reference(queries, keys, values, None)
    assert jnp.allclose(out3, ref3, **TOL_F32), "mismatch vs reference (no mask)"

    # 4) bf16 MXU-operand path (halved input HBM traffic, native bf16 MXU throughput).
    out4 = jax.block_until_ready(
        dot_product_attention(queries, keys, values, valid_lens, mxu_dtype=jnp.bfloat16))
    assert out4.shape == (B, Q, V)
    assert jnp.allclose(out4, ref, **TOL_BF16), "mismatch vs reference (bf16 MXU path)"

    print("KERNEL_OK")
</pallas_src>

<mosaic_0001>
module attributes {stable_mosaic.version = 11 : i64} {
  func.func @_attention_kernel_masked(%arg0: i32, %arg1: memref<1x8x8xf32, #tpu.memory_space<vmem>>, %arg2: memref<1x8x32xf32, #tpu.memory_space<vmem>>, %arg3: memref<1x8x32xf32, #tpu.memory_space<vmem>>, %arg4: memref<1x8x32xf32, #tpu.memory_space<vmem>>, %arg5: memref<1x8x32xf32, #tpu.memory_space<vmem>>) attributes {dimension_semantics = [#tpu.dimension_semantics<parallel>], iteration_bounds = array<i64: 2>, scalar_prefetch = 0 : i64, scratch_operands = 0 : i64, tpu.core_type = #tpu.core_type<tc>, window_params = [{transform_indices = @transform_0, window_bounds = array<i64: 1, 8, 8>}, {transform_indices = @transform_1, window_bounds = array<i64: 1, 8, 32>}, {transform_indices = @transform_2, window_bounds = array<i64: 1, 8, 32>}, {transform_indices = @transform_3, window_bounds = array<i64: 1, 8, 32>}, {transform_indices = @transform_4, window_bounds = array<i64: 1, 8, 32>}]} {
    %c0 = arith.constant 0 : index
    %c0_0 = arith.constant 0 : index
    %c0_1 = arith.constant 0 : index
    %0 = vector.load %arg2[%c0, %c0_0, %c0_1] : memref<1x8x32xf32, #tpu.memory_space<vmem>>, vector<1x8x32xf32>
    %c0_2 = arith.constant 0 : index
    %c0_3 = arith.constant 0 : index
    %c0_4 = arith.constant 0 : index
    %1 = vector.load %arg3[%c0_2, %c0_3, %c0_4] : memref<1x8x32xf32, #tpu.memory_space<vmem>>, vector<1x8x32xf32>
    %c0_5 = arith.constant 0 : index
    %c0_6 = arith.constant 0 : index
    %c0_7 = arith.constant 0 : index
    %2 = vector.load %arg4[%c0_5, %c0_6, %c0_7] : memref<1x8x32xf32, #tpu.memory_space<vmem>>, vector<1x8x32xf32>
    %c0_8 = arith.constant 0 : index
    %c0_9 = arith.constant 0 : index
    %c0_10 = arith.constant 0 : index
    %3 = vector.load %arg1[%c0_8, %c0_9, %c0_10] : memref<1x8x8xf32, #tpu.memory_space<vmem>>, vector<1x8x8xf32>
    "tpu.trace_start"() <{level = 10 : i32, message = "bqd,bkd->bqk"}> : () -> ()
    %cst = arith.constant dense<0.000000e+00> : vector<1x8x8xf32>
    %4 = tpu.matmul %0, %1, %cst {dimension_numbers = #tpu.dot_dimension_numbers<[2], [2], [1], [1], [0, 0, 0, 1, 1, 1], [0], [0]>} : vector<1x8x32xf32>, vector<1x8x32xf32>, vector<1x8x8xf32> -> vector<1x8x8xf32>
    "tpu.trace_stop"() : () -> ()
    %cst_11 = arith.constant 0.176776692 : f32
    %5 = vector.broadcast %cst_11 : f32 to vector<1x8x8xf32>
    %6 = arith.mulf %4, %5 : vector<1x8x8xf32>
    %cst_12 = arith.constant 0.000000e+00 : f32
    %7 = vector.broadcast %cst_12 : f32 to vector<1x8x8xf32>
    %8 = arith.cmpf oeq, %3, %7 : vector<1x8x8xf32>
    %9 = arith.select %8, %6, %3 : vector<1x8x8xi1>, vector<1x8x8xf32>
    %cst_13 = arith.constant dense<0xFF800000> : vector<1x8xf32>
    %10 = vector.multi_reduction <maximumf>, %9, %cst_13 [2] : vector<1x8x8xf32> to vector<1x8xf32>
    %11 = vector.shape_cast %10 : vector<1x8xf32> to vector<1x8x1xf32>
    %12 = vector.broadcast %11 : vector<1x8x1xf32> to vector<1x8x8xf32>
    %13 = arith.subf %9, %12 : vector<1x8x8xf32>
    %14 = math.exp %13 : vector<1x8x8xf32>
    %cst_14 = arith.constant dense<0.000000e+00> : vector<1x8xf32>
    %15 = vector.multi_reduction <add>, %14, %cst_14 [2] : vector<1x8x8xf32> to vector<1x8xf32>
    %16 = vector.shape_cast %15 : vector<1x8xf32> to vector<1x8x1xf32>
    %17 = tpu.reciprocal %16 {approx = true} : vector<1x8x1xf32> -> vector<1x8x1xf32>
    %18 = vector.broadcast %17 : vector<1x8x1xf32> to vector<1x8x8xf32>
    %19 = arith.mulf %14, %18 : vector<1x8x8xf32>
    "tpu.trace_start"() <{level = 10 : i32, message = "bqk,bkv->bqv"}> : () -> ()
    %cst_15 = arith.constant dense<0.000000e+00> : vector<1x8x32xf32>
    %20 = tpu.matmul %19, %2, %cst_15 {dimension_numbers = #tpu.dot_dimension_numbers<[2], [1], [1], [2], [0, 0, 0, 1, 1, 2], [0], [0]>} : vector<1x8x8xf32>, vector<1x8x32xf32>, vector<1x8x32xf32> -> vector<1x8x32xf32>
    "tpu.trace_stop"() : () -> ()
    %c0_16 = arith.constant 0 : index
    %c0_17 = arith.constant 0 : index
    %c0_18 = arith.constant 0 : index
    %21 = vector.load %arg5[%c0_16, %c0_17, %c0_18] : memref<1x8x32xf32, #tpu.memory_space<vmem>>, vector<1x8x32xf32>
    tpu.vector_store %arg5[%c0_16, %c0_17, %c0_18], %20 {strides = array<i32>} : memref<1x8x32xf32, #tpu.memory_space<vmem>>, vector<1x8x32xf32>,
    return
  }
  func.func @transform_0(%arg0: i32) -> (i32, i32, i32) {
    %c0_i32 = arith.constant 0 : i32
    %c0_i32_0 = arith.constant 0 : i32
    %c0_i32_1 = arith.constant 0 : i32
    return %arg0, %c0_i32, %c0_i32_0 : i32, i32, i32
  }
  func.func @transform_1(%arg0: i32) -> (i32, i32, i32) {
    %c0_i32 = arith.constant 0 : i32
    %c0_i32_0 = arith.constant 0 : i32
    %c0_i32_1 = arith.constant 0 : i32
    return %arg0, %c0_i32, %c0_i32_0 : i32, i32, i32
  }
  func.func @transform_2(%arg0: i32) -> (i32, i32, i32) {
    %c0_i32 = arith.constant 0 : i32
    %c0_i32_0 = arith.constant 0 : i32
    %c0_i32_1 = arith.constant 0 : i32
    return %arg0, %c0_i32, %c0_i32_0 : i32, i32, i32
  }
  func.func @transform_3(%arg0: i32) -> (i32, i32, i32) {
    %c0_i32 = arith.constant 0 : i32
    %c0_i32_0 = arith.constant 0 : i32
    %c0_i32_1 = arith.constant 0 : i32
    return %arg0, %c0_i32, %c0_i32_0 : i32, i32, i32
  }
  func.func @transform_4(%arg0: i32) -> (i32, i32, i32) {
    %c0_i32 = arith.constant 0 : i32
    %c0_i32_0 = arith.constant 0 : i32
    %c0_i32_1 = arith.constant 0 : i32
    return %arg0, %c0_i32, %c0_i32_0 : i32, i32, i32
  }
}

</mosaic_0001>

<bundles_post_ra>
// kernel: tpu_custom_call.1
= control target key start
LH: loop header
LB: loop body
LE: loop exit
PB: predicated region body
PF: predicated region fallthrough
CT: control target
= control target key end

     0   :  { %s1246_s0 = inlined_call_operand.hbm [shape: f32[2,8,8], index: 0, kind: input, shape index: {}]   ;;  %s1247_s1 = inlined_call_operand.hbm [shape: f32[2,8,32], index: 1, kind: input, shape index: {}]   ;;  %s1248_s2 = inlined_call_operand.hbm [shape: f32[2,8,32], index: 2, kind: input, shape index: {}]   ;;  %s1249_s3 = inlined_call_operand.hbm [shape: f32[2,8,32], index: 3, kind: input, shape index: {}]   ;;  %s1250_s4 = inlined_call_operand.hbm [shape: f32[2,8,32], index: 4, kind: output, shape index: {}]  }
   0x1   :  { %1256 = sst [smem:[#allocation17_spill]] %s1247_s1 }
   0x2   :  { %9 = vsyncpa [#allocation3], 0 }
   0x3   :  { %11 = vsyncpa [#allocation3 + $0x1], 0 }
   0x4   :  { %12 = vsyncpa [#allocation6], 0 }
   0x5   :  { %14 = vsyncpa [#allocation6 + $0x1], 0 }
   0x6   :  { %15 = vsyncpa [#allocation9], 0 }
   0x7   :  { %17 = vsyncpa [#allocation9 + $0x1], 0 }
   0x8   :  { %18 = vsyncpa [#allocation4], 0 }
   0x9   :  { %20 = vsyncpa [#allocation4 + $0x1], 0  ;;  %s974_s15 = smov 0   ;;  %s976_s16 = smov 0  }
   0xa   :  { %s978_s17 = smov 0   ;;  %s980_s18 = smov 0  }
   0xb LB: > { %1257 = sst [smem:[#allocation15_spill]] %s936_s17  ;;  %s995_s19 = sadd.s32 4294967295, %s940_s18   ;;  %s940_s18 = sphi %s980_s18, %s1279_s18   ;;  %s936_s17 = sphi %s978_s17, %s1276_s17   ;;  %s932_s16 = sphi %s976_s16, %s1278_s16   ;;  %s928_s15 = sphi %s974_s15, %s1277_s15  }
   0xc   : > { %s641_s20 = sadd.s32 4294967294, %s940_s18   ;;  %s999_s21 = sadd.s32 1, %s940_s18  }
   0xd   : > { %s33_s22 = sadd.s32 1, %s936_s17  ;;  %s30_s23 = ssub.s32 %s940_s18, %s999_s21 }
   0xe   : > { %p40_p0 = scmp.ne.s32.totalorder %s936_s17, %s932_s16  ;;  %p31_p1 = scmp.eq.s32.totalorder %s30_s23, 0 }
   0xf   : > { %p41_p2 = scmp.eq.s32.totalorder %s940_s18, 0  ;;  %p46_p3 = scmp.ne.s32.totalorder %s932_s16, %s928_s15 }
  0x10   : > { %p47_p4 = scmp.eq.s32.totalorder %s995_s19, 0  ;;  %p148_p7 = scmp.eq.s32.totalorder %s995_s19, 1 }
  0x11   : > { %s1011_s24 = scalar_select %p31_p1, %s936_s17, %s33_s22  }
  0x12   : > { %p42_p5 = por %p41_p2, %p40_p0  ;;  %p1013_p6 = por %p47_p4, %p46_p3 }
  0x13   : > { %1258 = sst [smem:[#allocation16_spill]] %s1011_s24  ;;  %p154_p8 = scmp.eq.s32.totalorder %s641_s20, 1 }
  0x14   : > { %s1259_s25 = scalar_select %p1013_p6, 1, 0 }
  0x15   : > { %p706_p10 = scmp.lt.s32.totalorder %s940_s18, 2  ;;  %p1020_p11 = por %p148_p7, %p40_p0 }
  0x16   : > { %p1024_p12 = por %p154_p8, %p46_p3  ;;  %s1029_s28 = sand.u32 1, %s936_s17  }
  0x17   : > { %s1260_s26 = scalar_select %p1020_p11, 1, 0 }
  0x18   : > { %s1261_s27 = scalar_select %p1024_p12, 1, 0 }
  0x19   : > { %s1032_s29 = sshll.u32 %s940_s18, 7  ;;  %s1035_s30 = sshll.u32 %s1029_s28, 3 }
  0x1a   : > { %p1037_p13 = pnand %p706_p10, %p42_p5  ;;  %s192_s6 = sand.u32 1, %s940_s18  }
  0x1b   : > { %s1263_s1 = sld [smem:[#allocation17_spill]]  ;;  %s196_s10 = scalar_lea.vmem [#allocation5], %s1035_s30 }
  0x1c   : > { %s1262_s5 = scalar_select %p1037_p13, 1, 0 }
  0x1d   : > { %s203_s11 = sshll.u32 %s196_s10, 4  ;;  %s1052_s12 = scalar_lea.sflag [#allocation6], %s192_s6  ;;  %s1049_s11 = int_to_ptr.vmem [resolvable:$true] %s203_s11 }
  0x1e   : > { %p1058_p2 = pneg %p1037_p13 }
  0x21   : > { %s1046_s9 = scalar_lea.hbm %s1263_s1, %s1032_s29  ;;  %s751_s23 = scalar_lea.hbm %s1263_s1, 256 }
  0x22   : > { %s746_s13 = scalar_lea.hbm %s1046_s9, 128  ;;  %p752_p5 = scmp.lt.u32.totalorder %s1046_s9, %s1263_s1 }
  0x23   : > { %p747_p1 = scmp.ne.s32.totalorder %s1046_s9, %s746_s13  ;;  %p753_p7 = scmp.lt.u32.totalorder %s751_s23, %s746_s13 }
  0x24   : > { %p755_p10 = scmp.lt.u32.totalorder %s746_s13, %s1046_s9 }
  0x25   : > { %p749_p3 = pnand %p1058_p2, %p747_p1  ;;  %p754_p8 = por %p753_p7, %p752_p5 }
  0x27   : > { %p750_p4 = pneg %p749_p3  ;;  %p756_p9 = por %p755_p10, %p754_p8 }
  0x29   : > { %p757_p0 = pnand %p756_p9, %p750_p4 }
  0x2b   : > { %760 = shalt.err (!%p757_p0)
}
  0x2c   : > { %s761_s6 = scalar_lea.vmem %s1049_s11, 128  ;;  %s942_s10 = smov [#allocation5]  }
  0x2d   : > { %p762_p1 = scmp.ne.s32.totalorder %s1049_s11, %s761_s6  ;;  %s766_s20 = sshll.u32 %s942_s10, 4  ;;  %s767_s20 = int_to_ptr.vmem [resolvable:$false] %s766_s20 }
  0x2e   : > { %s768_s22 = scalar_lea.vmem %s767_s20, 256  ;;  %p769_p11 = scmp.lt.s32.totalorder %s1049_s11, %s767_s20 }
  0x2f   : > { %p764_p3 = pnand %p762_p1, %p1058_p2  ;;  %p770_p6 = scmp.lt.s32.totalorder %s768_s22, %s761_s6 }
  0x31   : > { %p765_p12 = pneg %p764_p3  ;;  %p771_p5 = por %p770_p6, %p769_p11 }
  0x33   : > { %p772_p7 = pnand %p771_p5, %p765_p12 }
  0x35   : > { %775 = shalt.err (!%p772_p7)
}
  0x36   : > { %695 = dma.hbm_to_vmem [thread:$0]  (!%p1037_p13), %s1046_s9, 128, %s1049_s11, %s1052_s12  }
  0x37   : > { %p244_p9 = scmp.lt.s32.totalorder %s940_s18, 3  ;;  %s1087_s7 = scalar_lea.hbm %s1246_s0, %s1032_s29 }
  0x38   : > { %p1265_p6 = scmp.ge.s32.totalorder %s940_s18, 1  ;;  %s178_s6 = scalar_lea.vmem [#allocation2], %s1035_s30 }
  0x39   : > { %s185_s10 = sshll.u32 %s178_s6, 4  ;;  %s175_s20 = scalar_lea.sflag [#allocation3], %s1029_s28  ;;  %s186_s10 = int_to_ptr.vmem [resolvable:$true] %s185_s10 }
  0x3a   : > { %p1091_p11 = pnand %p1265_p6, %p244_p9  ;;  %s776_s9 = scalar_lea.hbm %s1087_s7, 128 }
  0x3b   : > { %p777_p12 = scmp.ne.s32.totalorder %s1087_s7, %s776_s9  ;;  %s781_s13 = scalar_lea.hbm %s1246_s0, 256 }
  0x3c   : > { %s1266_s8 = scalar_select %p1091_p11, 1, 0 }
  0x3d   : > { %p779_p0 = pnand %p777_p12, %p1058_p2  ;;  %p782_p8 = scmp.lt.u32.totalorder %s1087_s7, %s1246_s0 }
  0x3e   : > { %p783_p10 = scmp.lt.u32.totalorder %s781_s13, %s776_s9  ;;  %p785_p3 = scmp.lt.u32.totalorder %s776_s9, %s1087_s7 }
  0x3f   : > { %p780_p4 = pneg %p779_p0 }
  0x40   : > { %p784_p1 = por %p783_p10, %p782_p8 }
  0x42   : > { %p786_p5 = por %p785_p3, %p784_p1 }
  0x44   : > { %p787_p7 = pnand %p786_p5, %p780_p4 }
  0x46   : > { %790 = shalt.err (!%p787_p7)
}
  0x47   : > { %s791_s6 = scalar_lea.vmem %s186_s10, 128  ;;  %s943_s24 = smov [#allocation2]  }
  0x48   : > { %p792_p9 = scmp.ne.s32.totalorder %s186_s10, %s791_s6  ;;  %s796_s17 = sshll.u32 %s943_s24, 4  ;;  %s797_s17 = int_to_ptr.vmem [resolvable:$false] %s796_s17 }
  0x49   : > { %s798_s11 = scalar_lea.vmem %s797_s17, 256  ;;  %p799_p0 = scmp.lt.s32.totalorder %s186_s10, %s797_s17 }
  0x4a   : > { %p794_p6 = pnand %p792_p9, %p1058_p2  ;;  %p800_p11 = scmp.lt.s32.totalorder %s798_s11, %s791_s6 }
  0x4c   : > { %p795_p12 = pneg %p794_p6  ;;  %p801_p13 = por %p800_p11, %p799_p0 }
  0x4e   : > { %p802_p8 = pnand %p801_p13, %p795_p12 }
  0x50   : > { %805 = shalt.err (!%p802_p8)
}
  0x51   : > { %p1267_p10 = scmp.ne.s32.totalorder %s1262_s5, 0  ;;  %s1118_s22 = scalar_lea.hbm %s1248_s2, %s1032_s29 }
  0x52   : > { %s214_s17 = scalar_lea.vmem [#allocation7], %s1035_s30  ;;  %s806_s13 = scalar_lea.hbm %s1118_s22, 128 }
  0x53   : > { %692 = dma.hbm_to_vmem [thread:$0]  (!%p1267_p10), %s1087_s7, 128, %s186_s10, %s175_s20  }
  0x54   : > { %s221_s24 = sshll.u32 %s214_s17, 4  ;;  %p807_p13 = scmp.ne.s32.totalorder %s1118_s22, %s806_s13  ;;  %s222_s24 = int_to_ptr.vmem [resolvable:$true] %s221_s24 }
  0x55   : > { %s811_s7 = scalar_lea.hbm %s1248_s2, 256  ;;  %p812_p1 = scmp.lt.u32.totalorder %s1118_s22, %s1248_s2 }
  0x56   : > { %p809_p11 = pnand %p807_p13, %p1058_p2  ;;  %p813_p3 = scmp.lt.u32.totalorder %s811_s7, %s806_s13 }
  0x57   : > { %p815_p7 = scmp.lt.u32.totalorder %s806_s13, %s1118_s22 }
  0x58   : > { %p810_p4 = pneg %p809_p11  ;;  %p814_p5 = por %p813_p3, %p812_p1 }
  0x5a   : > { %p816_p9 = por %p815_p7, %p814_p5 }
  0x5c   : > { %p817_p6 = pnand %p816_p9, %p810_p4 }
  0x5e   : > { %820 = shalt.err (!%p817_p6)
}
  0x5f   : > { %s821_s11 = scalar_lea.vmem %s222_s24, 128  ;;  %s944_s1 = smov [#allocation7]  }
  0x60   : > { %p822_p12 = scmp.ne.s32.totalorder %s222_s24, %s821_s11  ;;  %s826_s9 = sshll.u32 %s944_s1, 4  ;;  %s827_s9 = int_to_ptr.vmem [resolvable:$false] %s826_s9 }
  0x61   : > { %s828_s17 = scalar_lea.vmem %s827_s9, 256  ;;  %p829_p13 = scmp.lt.s32.totalorder %s222_s24, %s827_s9 }
  0x62   : > { %p824_p0 = pnand %p822_p12, %p1058_p2  ;;  %p830_p11 = scmp.lt.s32.totalorder %s828_s17, %s821_s11 }
  0x64   : > { %p825_p8 = pneg %p824_p0  ;;  %p831_p10 = por %p830_p11, %p829_p13 }
  0x66   : > { %p832_p1 = pnand %p831_p10, %p825_p8 }
  0x68   : > { %835 = shalt.err (!%p832_p1)
}
  0x69   : > { %p1268_p3 = scmp.ne.s32.totalorder %s1262_s5, 0  ;;  %s1143_s6 = scalar_lea.hbm %s1249_s3, %s1032_s29 }
  0x6a   : > { %s232_s7 = scalar_lea.vmem [#allocation8], %s1035_s30  ;;  %s229_s20 = scalar_lea.sflag [#allocation9], %s1029_s28 }
  0x6b   : > { %698 = dma.hbm_to_vmem [thread:$0]  (!%p1268_p3), %s1118_s22, 128, %s222_s24, %s1052_s12  }
  0x6c   : > { %s239_s10 = sshll.u32 %s232_s7, 4  ;;  %s836_s11 = scalar_lea.hbm %s1143_s6, 128  ;;  %s240_s10 = int_to_ptr.vmem [resolvable:$true] %s239_s10 }
  0x6d   : > { %p837_p10 = scmp.ne.s32.totalorder %s1143_s6, %s836_s11  ;;  %s841_s22 = scalar_lea.hbm %s1249_s3, 256 }
  0x6e   : > { %p842_p7 = scmp.lt.u32.totalorder %s1143_s6, %s1249_s3  ;;  %p843_p9 = scmp.lt.u32.totalorder %s841_s22, %s836_s11 }
  0x6f   : > { %p839_p4 = pnand %p837_p10, %p1058_p2  ;;  %p845_p12 = scmp.lt.u32.totalorder %s836_s11, %s1143_s6 }
  0x70   : > { %p844_p6 = por %p843_p9, %p842_p7 }
  0x71   : > { %p840_p5 = pneg %p839_p4 }
  0x72   : > { %p846_p0 = por %p845_p12, %p844_p6 }
  0x74   : > { %p847_p8 = pnand %p846_p0, %p840_p5 }
  0x76   : > { %850 = shalt.err (!%p847_p8)
}
  0x77   : > { %s851_s28 = scalar_lea.vmem %s240_s10, 128  ;;  %s945_s30 = smov [#allocation8]  }
  0x78   : > { %p852_p13 = scmp.ne.s32.totalorder %s240_s10, %s851_s28  ;;  %s856_s9 = sshll.u32 %s945_s30, 4  ;;  %s857_s9 = int_to_ptr.vmem [resolvable:$false] %s856_s9 }
  0x79   : > { %s858_s17 = scalar_lea.vmem %s857_s9, 256  ;;  %p859_p10 = scmp.lt.s32.totalorder %s240_s10, %s857_s9 }
  0x7a   : > { %p854_p11 = pnand %p852_p13, %p1058_p2  ;;  %p860_p4 = scmp.lt.s32.totalorder %s858_s17, %s851_s28 }
  0x7c   : > { %p855_p1 = pneg %p854_p11  ;;  %p861_p3 = por %p860_p4, %p859_p10 }
  0x7e   : > { %p862_p7 = pnand %p861_p3, %p855_p1 }
  0x80   : > { %865 = shalt.err (!%p862_p7)
}
  0x81   : > { %p1269_p9 = scmp.ne.s32.totalorder %s1262_s5, 0  ;;  %p1270_p5 = scmp.ne.s32.totalorder %s1266_s8, 0 }
  0x82   : > { %s1167_s14 = sand.u32 (!%p1270_p5), 1, %s932_s16   ;;  %p1271_p2 = scmp.ne.s32.totalorder (!%p1270_p5), %s1259_s25, 0 }
  0x83   : > { %701 = dma.hbm_to_vmem [thread:$0]  (!%p1269_p9), %s1143_s6, 128, %s240_s10, %s229_s20  }
  0x84   : > { %248 = sbr.rel (%p1270_p5) target bundleno = 907 (0x38b), region = 36  ;;  %s1170_s13 = sshll.u32 (!%p1270_p5), %s1167_s14, 3 }
  0x85   : > { %s251_s23 = scalar_lea.sflag (!%p1270_p5), [#allocation3], %s1167_s14  ;;  %s254_s7 = scalar_lea.vmem (!%p1270_p5), [#allocation2], %s1170_s13 }
  0x8b   : > { %911 = dma.done.wait (%p1271_p2), %s251_s23, 128  }
  0x8c   : > { %913 = vsyncadd (%p1271_p2), %s251_s23, 4294967168  ;;  %s259_s5 = sand.u32 1, %s995_s19   ;;  %s263_s6 = scalar_lea.vmem [#allocation5], %s1170_s13 }
  0x8d   : > { %s260_s8 = scalar_lea.sflag [#allocation6], %s259_s5 }
  0x8e   : > { %915 = dma.done.wait (%p1271_p2), %s260_s8, 256  }
  0x8f   : > { %917 = vsyncadd (%p1271_p2), %s260_s8, 4294967040  ;;  %s272_s10 = scalar_lea.vmem [#allocation7], %s1170_s13  ;;  %s278_s20 = scalar_lea.sflag [#allocation9], %s1167_s14 }
  0x90   : > { %s281_s11 = scalar_lea.vmem [#allocation8], %s1170_s13 }
  0x91   : > { %919 = dma.done.wait (%p1271_p2), %s278_s20, 128  }
  0x92   : > { %921 = vsyncadd (%p1271_p2), %s278_s20, 4294967168  ;;  %v946_v0 = vmov 0.0   ;;  %vm947_vm0 = vmmov 0   ;;  %vm325_vm1 = vcmask 261120   ;;  %v322_v1 = vld [vmem:[%s272_s10] sm:$0xff]  ;;  %v321_v2 = vld [vmem:[%s263_s6] sm:$0xff] }
  0x93   : > { %669 = vmatprep.subr.mxu0 %v946_v0  ;;  %671 = vmatprep.mubr.msk.f32.mxu0 %vm947_vm0, %v946_v0  ;;  %v324_v3 = vld [vmem:[%s254_s7] sm:$0xff]  ;;  %vm405_vm3 = vcmask 64512   ;;  %v323_v14 = vld [vmem:[%s281_s11] sm:$0xff]  ;;  %s662_s25 = sshll.u32 %s995_s19, 7  ;;  %s320_s1 = scalar_lea.vmem [#allocation10], %s1170_s13 }
  0x94   : > { %674 = vmatprep.subr.mxu1 %v946_v0  ;;  %676 = vmatprep.mubr.msk.f32.mxu1 %vm947_vm0, %v946_v0  ;;  %vm403_vm2 = vcmp.eq.f32.partialorder %v324_v3, 0.0  ;;  %s505_s12 = sshll.u32 %s320_s1, 4  ;;  %s1201_s29 = scalar_lea.hbm %s1250_s4, %s662_s25  ;;  %s1203_s12 = int_to_ptr.vmem [resolvable:$true] %s505_s12 }
  0x95   : > { %670 = vmatpush3.xpose.msk.msra.mxu0 %vm325_vm1, %v322_v1  ;;  %675 = vmatpush3.msra.mxu1 %v323_v14  ;;  %s492_s28 = scalar_lea.sflag [#allocation4], %s1167_s14  ;;  %s866_s30 = scalar_lea.vmem %s1203_s12, 128 }
  0x96   : > { %p867_p3 = scmp.ne.s32.totalorder %s1203_s12, %s866_s30  ;;  %p1272_p6 = scmp.ne.s32.totalorder %s1260_s26, 0 }
  0x97   : > { %s948_s19 = smov [#allocation10]  }
  0x98   : > { %672 = vmatmul.mubr.msk.f32.vlgmr.msra.gmra.mrb[0].mxu0 %vm325_vm1, %v321_v2  ;;  %p868_p12 = pnand %p867_p3, %p1272_p6  ;;  %s870_s9 = sshll.u32 %s948_s19, 4  ;;  %s871_s9 = int_to_ptr.vmem [resolvable:$false] %s870_s9 }
  0x99   : > { %s872_s17 = scalar_lea.vmem %s871_s9, 256  ;;  %p873_p8 = scmp.lt.s32.totalorder %s1203_s12, %s871_s9 }
  0x9a   : > { %p869_p0 = pneg %p868_p12  ;;  %p874_p13 = scmp.lt.s32.totalorder %s872_s17, %s866_s30 }
  0x9c   : > { %p875_p11 = por %p874_p13, %p873_p8 }
  0x9e   : > { %p876_p1 = pnand %p875_p11, %p869_p0 }
 0x16b   : > { %v398_v4 = vpop.f32.mrb[0].mxu0 }
 0x16c   : > { %v402_v5 = vmul.f32 0.17677669, %v398_v4  ;;  %v673_v6 = vpop.f32.mrb[1].mxu0 }
 0x16e   : > { %v404_v7 = vsel %vm403_vm2, %v402_v5, %v324_v3 }
 0x16f   : > { %v406_v8 = vsel %vm405_vm3, %v404_v7, -inf }
 0x170   : > { %407 = vmax.xlane.f32.xlu0 %v406_v8 }
 0x1fd   : > { %v408_v9 = vpop.xlane.xlu0 %407 }
 0x1fe   : > { %v409_v10 = vsub.f32 %v404_v7, %v408_v9 }
 0x200   : > { %v410_v11 = vmul.f32 1.442695, %v409_v10 }
 0x202   : > { %742 = vpow2.f32 %v410_v11 }
 0x20c   : > { %v743_v12 = vpop.eup %742 }
 0x20d   : > { %v412_v13 = vsel %vm405_vm3, %v743_v12, 0.0 }
 0x20e   : > { %413 = vadd.xlane.f32.xlu0 %v412_v13 }
 0x29b   : > { %v414_v15 = vpop.xlane.xlu0 %413 }
 0x29c   : > { %744 = vrcp.f32 %v414_v15 }
 0x2a6   : > { %v745_v16 = vpop.eup %744 }
 0x2a7   : > { %v416_v17 = vmul.f32 %v745_v16, %v743_v12 }
 0x2a9   : > { %677 = vmatmul.mubr.msk.f32.vlgmr.msra.gmra.mrb[0].mxu1 %vm405_vm3, %v416_v17 }
 0x37c   : > { %v486_v18 = vpop.f32.mrb[0].mxu1 }
 0x37d   : > { %490 = vst.msk [vmem:[%s320_s1] sm:$0xff] %vm325_vm1, %v486_v18  ;;  %v678_v19 = vpop.f32.mrb[1].mxu1 }
 0x37e   : > { %879 = shalt.err (!%p876_p1)
}
 0x37f   : > { %s880_s14 = scalar_lea.hbm %s1201_s29, 128  ;;  %s884_s7 = scalar_lea.hbm %s1250_s4, 256 }
 0x380   : > { %p881_p10 = scmp.ne.s32.totalorder %s1201_s29, %s880_s14  ;;  %p885_p9 = scmp.lt.u32.totalorder %s1201_s29, %s1250_s4 }
 0x381   : > { %p886_p5 = scmp.lt.u32.totalorder %s884_s7, %s880_s14  ;;  %p888_p3 = scmp.lt.u32.totalorder %s880_s14, %s1201_s29 }
 0x382   : > { %p882_p4 = pnand %p881_p10, %p1272_p6 }
 0x383   : > { %p887_p2 = por %p886_p5, %p885_p9 }
 0x384   : > { %p883_p7 = pneg %p882_p4 }
 0x385   : > { %p889_p12 = por %p888_p3, %p887_p2 }
 0x387   : > { %p890_p0 = pnand %p889_p12, %p883_p7 }
 0x389   : > { %893 = shalt.err (!%p890_p0)
}
 0x38a   : > { %687 = dma.vmem_to_hbm [thread:$0]  (%p1272_p6), %s1203_s12, 128, %s1201_s29, %s492_s28  }
 0x38b PF: > { %s517_s6 = sand.u32 1, %s928_s15   ;;  %p1273_p8 = scmp.ne.s32.totalorder %s1261_s27, 0 }
 0x38c   : > { %p1274_p13 = scmp.ge.s32.totalorder %s940_s18, 2  ;;  %s518_s10 = scalar_lea.sflag [#allocation4], %s517_s6 }
 0x38e   : > { %p703_p11 = pnand %p1274_p13, %p1273_p8 }
 0x390   : > { %923 = dma.done.wait (!%p703_p11), %s518_s10, 128  }
 0x391   : > { %925 = vsyncadd (!%p703_p11), %s518_s10, 4294967168  ;;  %s1275_s20 = sld [smem:[#allocation15_spill]]  ;;  %s1276_s17 = sld [smem:[#allocation16_spill]] }
 0x392   : > { %p23_p1 = scmp.ge.s32.totalorder %s999_s21, 4   ;;  %s1277_s15 = smov %s932_s16 }
 0x393   : > { %s1279_s18 = smov %s999_s21 }
 0x394   :  { %25 = sbr.rel (!%p23_p1) target bundleno = 11 (0xb), region = 118 }
 0x397   : > { %s1278_s16 = smov %s1275_s20 }
 0x39b   :  { %523 = vsyncpa [#allocation3], 1 }
 0x39c   :  { %525 = vsyncpa [#allocation3 + $0x1], 1 }
 0x39d   :  { %526 = vsyncpa [#allocation6], 1 }
 0x39e   :  { %528 = vsyncpa [#allocation6 + $0x1], 1 }
 0x39f   :  { %529 = vsyncpa [#allocation9], 1 }
 0x3a0   :  { %531 = vsyncpa [#allocation9 + $0x1], 1 }
 0x3a1   :  { %532 = vsyncpa [#allocation4], 1 }
 0x3a2   :  { %534 = vsyncpa [#allocation4 + $0x1], 1 }

</bundles_post_ra>
